<compile_context>
chip_gen: v7x
topology: tpu7x:2x2x1
jax: 0.10.0
libtpu: 0.0.40
codegen_flags: <defaults>
</compile_context>

<pallas_src>
import functools

import jax
import jax.numpy as jnp
from jax.experimental import pallas as pl
from jax.experimental.pallas import tpu as pltpu

_LANES = 128
_SUBLANES = 8


def _round_up(v, m):
    return ((v + m - 1) // m) * m


def _pad2d(a, rows, cols):
    r, c = a.shape
    return jnp.pad(a, ((0, rows - r), (0, cols - c)))


def _fused_mlp_kernel(*refs, num_hidden, hidden_act):
    """refs = x, (w0, b0), ..., (w_{H-1}, b_{H-1}), w_head_row, b_head_scalar, out."""
    x_ref = refs[0]
    o_ref = refs[-1]
    b_head_ref = refs[-2]      # (1, 1) f32 in SMEM
    w_head_ref = refs[-3]      # (1, width_pad) f32 in VMEM

    # Hidden stack: MXU matmul (f32 accumulate) + f32 bias/activation on VPU/EUP.
    h_mxu = x_ref[...]
    h_f32 = h_mxu.astype(jnp.float32)
    for i in range(num_hidden):
        w_ref = refs[1 + 2 * i]
        b_ref = refs[2 + 2 * i]
        y = jnp.dot(h_mxu, w_ref[...], preferred_element_type=jnp.float32)
        y = y + b_ref[...]                       # (1, N_pad) broadcast over rows
        if hidden_act == "tanh":
            y = jnp.tanh(y)
        elif hidden_act == "relu":
            y = jnp.maximum(y, 0.0)
        # (padded lanes stay exactly 0: zero weights/bias -> act(0) == 0 for tanh/relu)
        h_f32 = y
        if i + 1 < num_hidden:
            h_mxu = y.astype(w_ref.dtype)        # cast only what feeds the next MXU pass

    # Head: (width, 1) matvec as VPU multiply + XLU lane-reduce (MXU stays free,
    # avoids a 1-lane masked store). Bias is a scalar read from SMEM.
    w_row = w_head_ref[...].astype(jnp.float32)                    # (1, width_pad)
    logits = jnp.sum(h_f32 * w_row, axis=-1, keepdims=True)        # (TM, 1)
    logits = logits + b_head_ref[0, 0]
    out = jax.nn.sigmoid(logits)
    # Lane-dense store: broadcast across the 128-lane output tile; wrapper keeps col 0.
    o_ref[...] = jnp.broadcast_to(out, o_ref.shape).astype(o_ref.dtype)


def mlp_forward(x, params, activation, mxu_dtype=jnp.float32):
    """Forward pass matching the PyTorch MLP: hidden Linear+act, final Linear+Sigmoid.

    x: (batch, input_size) f32.  params: list of (W(in,out), b(1,out)) f32 arrays.
    mxu_dtype: jnp.float32 (safe everywhere) or jnp.bfloat16 (faster MXU on v6e/v7x);
    accumulation, bias and activation math stay in float32 either way.
    """
    batch, in_features = x.shape
    num_hidden = len(params) - 1
    assert num_hidden >= 1

    in_pad = _round_up(in_features, _LANES)
    tm = _LANES if batch >= _LANES else _round_up(batch, _SUBLANES)
    b_pad = _round_up(batch, tm)

    args = [_pad2d(x, b_pad, in_pad).astype(mxu_dtype)]
    in_specs = [pl.BlockSpec((tm, in_pad), lambda i: (i, 0))]

    prev_pad = in_pad
    flops = 0
    for (w, b) in params[:-1]:
        din, dout = w.shape
        assert din <= prev_pad
        dout_pad = _round_up(dout, _LANES)
        args.append(_pad2d(w, prev_pad, dout_pad).astype(mxu_dtype))
        args.append(_pad2d(b, 1, dout_pad))  # bias stays f32
        in_specs.append(pl.BlockSpec((prev_pad, dout_pad), lambda i: (0, 0)))
        in_specs.append(pl.BlockSpec((1, dout_pad), lambda i: (0, 0)))
        flops += 2 * b_pad * prev_pad * dout_pad
        prev_pad = dout_pad

    # Head layer (width -> 1): pass weight as a padded row vector + scalar bias in SMEM.
    w_head, b_head = params[-1]
    assert w_head.shape[1] == 1
    args.append(_pad2d(w_head.T.astype(jnp.float32), 1, prev_pad))
    args.append(b_head.reshape(1, 1).astype(jnp.float32))
    in_specs.append(pl.BlockSpec((1, prev_pad), lambda i: (0, 0)))
    in_specs.append(pl.BlockSpec(memory_space=pltpu.MemorySpace.SMEM))
    flops += 2 * b_pad * prev_pad

    out_shape = jax.ShapeDtypeStruct((b_pad, _LANES), jnp.float32)
    out_spec = pl.BlockSpec((tm, _LANES), lambda i: (i, 0))

    transcendentals = b_pad * (num_hidden * prev_pad + 1) if activation == "tanh" else b_pad
    bytes_accessed = sum(int(a.size) * a.dtype.itemsize for a in args) + b_pad * _LANES * 4

    kernel = functools.partial(
        _fused_mlp_kernel, num_hidden=num_hidden, hidden_act=activation
    )

    out_padded = pl.pallas_call(
        kernel,
        out_shape=out_shape,
        grid_spec=pltpu.PrefetchScalarGridSpec(
            num_scalar_prefetch=0,
            grid=(b_pad // tm,),
            in_specs=in_specs,
            out_specs=out_spec,
        ),
        compiler_params=pltpu.CompilerParams(
            dimension_semantics=("parallel",),        # shard batch tiles across TCs (v7x)
            vmem_limit_bytes=32 * 1024 * 1024,        # explicit, fits every generation
        ),
        cost_estimate=pl.CostEstimate(
            flops=flops,
            transcendentals=transcendentals,
            bytes_accessed=bytes_accessed,
        ),
    )(*args)

    return out_padded[:batch, :1]


def init_mlp_params(key, input_size, width, depth):
    """Deterministic PyTorch-nn.Linear-style init (uniform +-1/sqrt(fan_in)).

    Weights stored (in_features, out_features) so each layer is y = x @ W + b.
    """
    dims = [input_size] + [width] * (depth - 1) + [1]
    params = []
    for i in range(len(dims) - 1):
        fan_in, fan_out = dims[i], dims[i + 1]
        key, kw, kb = jax.random.split(key, 3)
        bound = 1.0 / (fan_in ** 0.5)
        w = jax.random.uniform(kw, (fan_in, fan_out), jnp.float32, -bound, bound)
        b = jax.random.uniform(kb, (1, fan_out), jnp.float32, -bound, bound)
        params.append((w, b))
    return params


def _reference(x, params, activation):
    h = x
    for i, (w, b) in enumerate(params):
        h = h @ w + b
        if i == len(params) - 1:
            h = jax.nn.sigmoid(h)
        elif activation == "tanh":
            h = jnp.tanh(h)
        elif activation == "relu":
            h = jnp.maximum(h, 0.0)
    return h


if __name__ == "__main__":
    input_size = 16
    width = 32
    depth = 3
    activation = "tanh"

    key = jax.random.PRNGKey(0)
    key, kx = jax.random.split(key)
    params = init_mlp_params(key, input_size, width, depth)

    # --- run 1: small batch, f32 MXU path (strict check) ---
    batch = 8
    x = jax.random.normal(kx, (batch, input_size), jnp.float32)
    out = jax.block_until_ready(mlp_forward(x, params, activation))
    ref = _reference(x, params, activation)
    assert out.shape == (batch, 1)
    assert jnp.allclose(out, ref, atol=1e-5), "f32 mismatch vs reference"

    # --- run 2: larger batch exercising the parallel M grid + bf16 MXU inputs ---
    batch2 = 200
    key, kx2 = jax.random.split(key)
    x2 = jax.random.normal(kx2, (batch2, input_size), jnp.float32)
    out2 = jax.block_until_ready(
        mlp_forward(x2, params, activation, mxu_dtype=jnp.bfloat16)
    )
    ref2 = _reference(x2, params, activation)
    assert out2.shape == (batch2, 1)
    assert jnp.allclose(out2, ref2, atol=5e-2), "bf16 mismatch vs reference"

    print("KERNEL_OK")
</pallas_src>

<mosaic_0001>
module attributes {stable_mosaic.version = 11 : i64} {
  func.func @_fused_mlp_kernel(%arg0: i32, %arg1: memref<8x128xf32, #tpu.memory_space<vmem>>, %arg2: memref<128x128xf32, #tpu.memory_space<vmem>>, %arg3: memref<1x128xf32, #tpu.memory_space<vmem>>, %arg4: memref<128x128xf32, #tpu.memory_space<vmem>>, %arg5: memref<1x128xf32, #tpu.memory_space<vmem>>, %arg6: memref<1x128xf32, #tpu.memory_space<vmem>>, %arg7: memref<1x1xf32, #tpu.memory_space<smem>>, %arg8: memref<8x128xf32, #tpu.memory_space<vmem>>) attributes {dimension_semantics = [#tpu.dimension_semantics<parallel>], iteration_bounds = array<i64: 1>, scalar_prefetch = 0 : i64, scratch_operands = 0 : i64, tpu.core_type = #tpu.core_type<tc>, window_params = [{transform_indices = @transform_0, window_bounds = array<i64: 8, 128>}, {pipeline_mode = #tpu.pipeline_mode<synchronous>, transform_indices = @transform_1, window_bounds = array<i64: 128, 128>}, {pipeline_mode = #tpu.pipeline_mode<synchronous>, transform_indices = @transform_2, window_bounds = array<i64: 1, 128>}, {pipeline_mode = #tpu.pipeline_mode<synchronous>, transform_indices = @transform_3, window_bounds = array<i64: 128, 128>}, {pipeline_mode = #tpu.pipeline_mode<synchronous>, transform_indices = @transform_4, window_bounds = array<i64: 1, 128>}, {pipeline_mode = #tpu.pipeline_mode<synchronous>, transform_indices = @transform_5, window_bounds = array<i64: 1, 128>}, {transform_indices = @transform_6, window_bounds = array<i64: 1, 1>}, {transform_indices = @transform_7, window_bounds = array<i64: 8, 128>}]} {
    %c0 = arith.constant 0 : index
    %c0_0 = arith.constant 0 : index
    %0 = vector.load %arg1[%c0, %c0_0] : memref<8x128xf32, #tpu.memory_space<vmem>>, vector<8x128xf32>
    %c0_1 = arith.constant 0 : index
    %c0_2 = arith.constant 0 : index
    %1 = vector.load %arg2[%c0_1, %c0_2] : memref<128x128xf32, #tpu.memory_space<vmem>>, vector<128x128xf32>
    %cst = arith.constant dense<0.000000e+00> : vector<8x128xf32>
    %2 = tpu.matmul %0, %1, %cst {dimension_numbers = #tpu.dot_dimension_numbers<[1], [0], [0], [1], [0, 0, 1, 1], [], []>} : vector<8x128xf32>, vector<128x128xf32>, vector<8x128xf32> -> vector<8x128xf32>
    %c0_3 = arith.constant 0 : index
    %c0_4 = arith.constant 0 : index
    %3 = vector.load %arg3[%c0_3, %c0_4] : memref<1x128xf32, #tpu.memory_space<vmem>>, vector<1x128xf32>
    %4 = vector.broadcast %3 : vector<1x128xf32> to vector<8x128xf32>
    %5 = arith.addf %2, %4 : vector<8x128xf32>
    %6 = math.tanh %5 : vector<8x128xf32>
    %c0_5 = arith.constant 0 : index
    %c0_6 = arith.constant 0 : index
    %7 = vector.load %arg4[%c0_5, %c0_6] : memref<128x128xf32, #tpu.memory_space<vmem>>, vector<128x128xf32>
    %cst_7 = arith.constant dense<0.000000e+00> : vector<8x128xf32>
    %8 = tpu.matmul %6, %7, %cst_7 {dimension_numbers = #tpu.dot_dimension_numbers<[1], [0], [0], [1], [0, 0, 1, 1], [], []>} : vector<8x128xf32>, vector<128x128xf32>, vector<8x128xf32> -> vector<8x128xf32>
    %c0_8 = arith.constant 0 : index
    %c0_9 = arith.constant 0 : index
    %9 = vector.load %arg5[%c0_8, %c0_9] : memref<1x128xf32, #tpu.memory_space<vmem>>, vector<1x128xf32>
    %10 = vector.broadcast %9 : vector<1x128xf32> to vector<8x128xf32>
    %11 = arith.addf %8, %10 : vector<8x128xf32>
    %12 = math.tanh %11 : vector<8x128xf32>
    %c0_10 = arith.constant 0 : index
    %c0_11 = arith.constant 0 : index
    %13 = vector.load %arg6[%c0_10, %c0_11] : memref<1x128xf32, #tpu.memory_space<vmem>>, vector<1x128xf32>
    %14 = vector.broadcast %13 : vector<1x128xf32> to vector<8x128xf32>
    %15 = arith.mulf %12, %14 : vector<8x128xf32>
    %cst_12 = arith.constant dense<0.000000e+00> : vector<8xf32>
    %16 = vector.multi_reduction <add>, %15, %cst_12 [1] : vector<8x128xf32> to vector<8xf32>
    %17 = vector.shape_cast %16 : vector<8xf32> to vector<8x1xf32>
    %c0_13 = arith.constant 0 : index
    %c0_14 = arith.constant 0 : index
    %18 = memref.load %arg7[%c0_13, %c0_14] : memref<1x1xf32, #tpu.memory_space<smem>>
    %19 = vector.broadcast %18 : f32 to vector<8x1xf32>
    %20 = arith.addf %17, %19 : vector<8x1xf32>
    %21 = arith.negf %20 : vector<8x1xf32>
    %22 = math.exp %21 : vector<8x1xf32>
    %cst_15 = arith.constant 1.000000e+00 : f32
    %23 = vector.broadcast %cst_15 : f32 to vector<8x1xf32>
    %24 = arith.addf %23, %22 : vector<8x1xf32>
    %25 = arith.divf %23, %24 : vector<8x1xf32>
    %26 = vector.shape_cast %25 : vector<8x1xf32> to vector<8x1xf32>
    %27 = vector.broadcast %26 : vector<8x1xf32> to vector<8x128xf32>
    %c0_16 = arith.constant 0 : index
    %c0_17 = arith.constant 0 : index
    %28 = vector.load %arg8[%c0_16, %c0_17] : memref<8x128xf32, #tpu.memory_space<vmem>>, vector<8x128xf32>
    tpu.vector_store %arg8[%c0_16, %c0_17], %27 {strides = array<i32>} : memref<8x128xf32, #tpu.memory_space<vmem>>, vector<8x128xf32>,
    return
  }
  func.func @transform_0(%arg0: i32) -> (i32, i32) {
    %c0_i32 = arith.constant 0 : i32
    %c0_i32_0 = arith.constant 0 : i32
    return %arg0, %c0_i32 : i32, i32
  }
  func.func @transform_1(%arg0: i32) -> (i32, i32) {
    %c0_i32 = arith.constant 0 : i32
    %c0_i32_0 = arith.constant 0 : i32
    %c0_i32_1 = arith.constant 0 : i32
    return %c0_i32, %c0_i32_0 : i32, i32
  }
  func.func @transform_2(%arg0: i32) -> (i32, i32) {
    %c0_i32 = arith.constant 0 : i32
    %c0_i32_0 = arith.constant 0 : i32
    %c0_i32_1 = arith.constant 0 : i32
    return %c0_i32, %c0_i32_0 : i32, i32
  }
  func.func @transform_3(%arg0: i32) -> (i32, i32) {
    %c0_i32 = arith.constant 0 : i32
    %c0_i32_0 = arith.constant 0 : i32
    %c0_i32_1 = arith.constant 0 : i32
    return %c0_i32, %c0_i32_0 : i32, i32
  }
  func.func @transform_4(%arg0: i32) -> (i32, i32) {
    %c0_i32 = arith.constant 0 : i32
    %c0_i32_0 = arith.constant 0 : i32
    %c0_i32_1 = arith.constant 0 : i32
    return %c0_i32, %c0_i32_0 : i32, i32
  }
  func.func @transform_5(%arg0: i32) -> (i32, i32) {
    %c0_i32 = arith.constant 0 : i32
    %c0_i32_0 = arith.constant 0 : i32
    %c0_i32_1 = arith.constant 0 : i32
    return %c0_i32, %c0_i32_0 : i32, i32
  }
  func.func @transform_6(%arg0: i32) -> (i32, i32) {
    %c0_i32 = arith.constant 0 : i32
    %c0_i32_0 = arith.constant 0 : i32
    %c0_i32_1 = arith.constant 0 : i32
    return %c0_i32, %c0_i32_0 : i32, i32
  }
  func.func @transform_7(%arg0: i32) -> (i32, i32) {
    %c0_i32 = arith.constant 0 : i32
    %c0_i32_0 = arith.constant 0 : i32
    return %arg0, %c0_i32 : i32, i32
  }
}

</mosaic_0001>

<bundles_post_ra>
// kernel: tpu_custom_call.1
= control target key start
LH: loop header
LB: loop body
LE: loop exit
PB: predicated region body
PF: predicated region fallthrough
CT: control target
= control target key end

     0   :  { %13 = vsyncpa [#allocation4], 0  ;;  %s690_s0 = inlined_call_operand.hbm [shape: f32[8,128], index: 0, kind: input, shape index: {}]   ;;  %s691_s1 = inlined_call_operand.hbm [shape: f32[128,128], index: 1, kind: input, shape index: {}]   ;;  %s692_s2 = inlined_call_operand.vmem [shape: f32[1,128], index: 2, kind: input, shape index: {}]   ;;  %s693_s3 = inlined_call_operand.hbm [shape: f32[128,128], index: 3, kind: input, shape index: {}]   ;;  %s694_s4 = inlined_call_operand.vmem [shape: f32[1,128], index: 4, kind: input, shape index: {}]   ;;  %s695_s5 = inlined_call_operand.vmem [shape: f32[1,128], index: 5, kind: input, shape index: {}]   ;;  %s696_s6 = inlined_call_operand.<no memory space> [shape: f32[1,1], index: 6, kind: input, shape index: {}]   ;;  %s697_s7 = inlined_call_operand.hbm [shape: f32[8,128], index: 7, kind: output, shape index: {}]  }
   0x1   :  { %14 = vsyncpa [#allocation7], 0 }
   0x2   :  { %15 = vsyncpa [#allocation5], 0  ;;  %s559_s24 = smov [#allocation6]   ;;  %s465_s28 = scalar_lea.hbm %s691_s1, 2048 }
   0x3   :  { %s31_s25 = sshll.u32 %s559_s24, 4  ;;  %p466_p0 = scmp.ne.s32.totalorder %s691_s1, %s465_s28  ;;  %s32_s25 = int_to_ptr.vmem [resolvable:$true] %s31_s25 }
   0x4   :  { %p469_p1 = scmp.lt.u32.totalorder %s465_s28, %s691_s1 }
   0x6   :  { %p471_p2 = pnand %p469_p1, %p466_p0 }
   0x8   :  { %474 = shalt.err (!%p471_p2)
}
   0x9   :  { %s475_s10 = scalar_lea.vmem %s32_s25, 2048  ;;  %p480_p4 = scmp.lt.s32.totalorder %s32_s25, %s32_s25 }
   0xa   :  { %p476_p3 = scmp.ne.s32.totalorder %s32_s25, %s475_s10  ;;  %p481_p5 = scmp.lt.s32.totalorder %s475_s10, %s475_s10 }
   0xc   :  { %p482_p6 = por %p481_p5, %p480_p4 }
   0xe   :  { %p483_p7 = pnand %p482_p6, %p476_p3 }
  0x10   :  { %486 = shalt.err (!%p483_p7)
}
  0x11   :  { %s560_s11 = smov 128   ;;  %s561_s12 = smov 8  }
  0x12   :  { %37 = dma.hbm_to_vmem [thread:$0]  %s691_s1, 2048, %s32_s25, [#allocation7], %s560_s11, %s560_s11, %s561_s12  }
  0x13   :  { %s562_s15 = smov [#allocation3]   ;;  %s563_s17 = smov [#allocation8]  }
  0x14   :  { %s22_s16 = sshll.u32 %s562_s15, 4  ;;  %s45_s18 = sshll.u32 %s563_s17, 4  ;;  %s23_s16 = int_to_ptr.vmem [resolvable:$true] %s22_s16  ;;  %s46_s18 = int_to_ptr.vmem [resolvable:$true] %s45_s18 }
  0x15   :  { %s487_s21 = scalar_lea.hbm %s690_s0, 128 }
  0x16   :  { %p488_p8 = scmp.ne.s32.totalorder %s690_s0, %s487_s21  ;;  %p491_p9 = scmp.lt.u32.totalorder %s487_s21, %s690_s0 }
  0x18   :  { %p493_p10 = pnand %p491_p9, %p488_p8 }
  0x1a   :  { %496 = shalt.err (!%p493_p10)
}
  0x1b   :  { %s497_s1 = scalar_lea.vmem %s23_s16, 128  ;;  %p502_p12 = scmp.lt.s32.totalorder %s23_s16, %s23_s16 }
  0x1c   :  { %p498_p11 = scmp.ne.s32.totalorder %s23_s16, %s497_s1  ;;  %p503_p13 = scmp.lt.s32.totalorder %s497_s1, %s497_s1 }
  0x1e   :  { %p504_p0 = por %p503_p13, %p502_p12 }
  0x20   :  { %p505_p1 = pnand %p504_p0, %p498_p11 }
  0x22   :  { %508 = shalt.err (!%p505_p1)
}
  0x23   :  { %25 = dma.hbm_to_vmem [thread:$0]  %s690_s0, 128, %s23_s16, [#allocation4]  }
  0x24   :  { %s509_s30 = scalar_lea.hbm %s693_s3, 2048 }
  0x25   :  { %p510_p2 = scmp.ne.s32.totalorder %s693_s3, %s509_s30  ;;  %p513_p3 = scmp.lt.u32.totalorder %s509_s30, %s693_s3 }
  0x27   :  { %p515_p4 = pnand %p513_p3, %p510_p2 }
  0x29   :  { %518 = shalt.err (!%p515_p4)
}
  0x2a   :  { %s519_s14 = scalar_lea.vmem %s46_s18, 2048  ;;  %p524_p6 = scmp.lt.s32.totalorder %s46_s18, %s46_s18 }
  0x2b   :  { %p520_p5 = scmp.ne.s32.totalorder %s46_s18, %s519_s14  ;;  %p525_p7 = scmp.lt.s32.totalorder %s519_s14, %s519_s14 }
  0x2d   :  { %p526_p8 = por %p525_p7, %p524_p6 }
  0x2f   :  { %p527_p9 = pnand %p526_p8, %p520_p5 }
  0x31   :  { %530 = shalt.err (!%p527_p9)
}
  0x32   :  { %51 = dma.hbm_to_vmem [thread:$0]  %s693_s3, 2048, %s46_s18, [#allocation7], %s560_s11, %s560_s11, %s561_s12  }
  0x33   :  { %553 = dma.done.wait [#allocation4], 128  }
  0x34   :  { %554 = vsyncadd [#allocation4], 4294967168 }
  0x35   :  { %555 = dma.done.wait [#allocation7], 4096  }
  0x36   :  { %556 = vsyncadd [#allocation7], 4294963200  ;;  %v564_v0 = vmov 0.0|0.0   ;;  %vm565_vm0 = vmmov 0   ;;  %v566_v1 = vmov 0.0   ;;  %v68_v2 = vld [vmem:[#allocation6] sm:$0xff]  ;;  %v267_v63 = vstv %s696_s6 }
  0x37   :  { %400 = vmatprep.subr.bf16.mxu0 %v564_v0  ;;  %362 = vmatprep.mubr.msk.f32.mxu0 %vm565_vm0, %v566_v1  ;;  %v69_v3 = vld [vmem:[#allocation6 + $0x8] sm:$0xff]  ;;  %v70_v4 = vld [vmem:[#allocation6 + $0x10] sm:$0xff]  ;;  %v71_v6 = vld [vmem:[#allocation6 + $0x18] sm:$0xff] }
  0x38   :  { %424 = vmatprep.subr.bf16.mxu1 %v564_v0  ;;  %397 = vmatprep.mubr.msk.f32.mxu1 %vm565_vm0, %v566_v1  ;;  %v401_v5 = vpack.c.bf16 %v69_v3, %v68_v2  ;;  %v404_v7 = vpack.c.bf16 %v71_v6, %v70_v4  ;;  %v72_v8 = vld [vmem:[#allocation6 + $0x20] sm:$0xff]  ;;  %v73_v9 = vld [vmem:[#allocation6 + $0x28] sm:$0xff]  ;;  %v164_v12 = vld [vmem:[#allocation8 + $0x10] sm:$0xff] }
  0x39   :  { %v162_v10 = vld [vmem:[#allocation8] sm:$0xff]  ;;  %v163_v11 = vld [vmem:[#allocation8 + $0x8] sm:$0xff]  ;;  %v165_v13 = vld [vmem:[#allocation8 + $0x18] sm:$0xff]  ;;  %v407_v14 = vpack.c.bf16 %v73_v9, %v72_v8 }
  0x3a   :  { %402 = vmatpush3.bf16.msra.mxu0 %v401_v5  ;;  %v425_v15 = vpack.c.bf16 %v163_v11, %v162_v10  ;;  %v74_v16 = vld [vmem:[#allocation6 + $0x30] sm:$0xff]  ;;  %v75_v17 = vld [vmem:[#allocation6 + $0x38] sm:$0xff]  ;;  %v428_v18 = vpack.c.bf16 %v165_v13, %v164_v12  ;;  %v166_v19 = vld [vmem:[#allocation8 + $0x20] sm:$0xff] }
  0x3b   :  { %403 = vmatprep.subr.bf16.mxu0 %v564_v0  ;;  %v167_v20 = vld [vmem:[#allocation8 + $0x28] sm:$0xff]  ;;  %v410_v21 = vpack.c.bf16 %v75_v17, %v74_v16  ;;  %v76_v22 = vld [vmem:[#allocation6 + $0x40] sm:$0xff]  ;;  %v168_v25 = vld [vmem:[#allocation8 + $0x30] sm:$0xff] }
  0x3c   :  { %426 = vmatpush3.bf16.msra.mxu1 %v425_v15  ;;  %v77_v23 = vld [vmem:[#allocation6 + $0x48] sm:$0xff]  ;;  %v431_v24 = vpack.c.bf16 %v167_v20, %v166_v19  ;;  %v169_v26 = vld [vmem:[#allocation8 + $0x38] sm:$0xff]  ;;  %v78_v28 = vld [vmem:[#allocation6 + $0x50] sm:$0xff] }
  0x3d   :  { %427 = vmatprep.subr.bf16.mxu1 %v564_v0  ;;  %v413_v27 = vpack.c.bf16 %v77_v23, %v76_v22  ;;  %v79_v29 = vld [vmem:[#allocation6 + $0x58] sm:$0xff]  ;;  %v434_v30 = vpack.c.bf16 %v169_v26, %v168_v25  ;;  %v170_v31 = vld [vmem:[#allocation8 + $0x40] sm:$0xff]  ;;  %v171_v32 = vld [vmem:[#allocation8 + $0x48] sm:$0xff] }
  0x3e   :  { %405 = vmatpush3.bf16.msra.mxu0 %v404_v7  ;;  %v416_v33 = vpack.c.bf16 %v79_v29, %v78_v28  ;;  %v80_v34 = vld [vmem:[#allocation6 + $0x60] sm:$0xff]  ;;  %v81_v35 = vld [vmem:[#allocation6 + $0x68] sm:$0xff]  ;;  %v437_v36 = vpack.c.bf16 %v171_v32, %v170_v31  ;;  %v82_v38 = vld [vmem:[#allocation6 + $0x70] sm:$0xff] }
  0x3f   :  { %406 = vmatprep.subr.bf16.mxu0 %v564_v0  ;;  %v419_v37 = vpack.c.bf16 %v81_v35, %v80_v34  ;;  %v83_v39 = vld [vmem:[#allocation6 + $0x78] sm:$0xff]  ;;  %v172_v42 = vld [vmem:[#allocation8 + $0x50] sm:$0xff]  ;;  %v174_v45 = vld [vmem:[#allocation8 + $0x60] sm:$0xff] }
  0x40   :  { %429 = vmatpush3.bf16.msra.mxu1 %v428_v18  ;;  %v422_v40 = vpack.c.bf16 %v83_v39, %v82_v38  ;;  %v67_v41 = vld [vmem:[#allocation3] sm:$0xff]  ;;  %v175_v46 = vld [vmem:[#allocation8 + $0x68] sm:$0xff]  ;;  %v176_v48 = vld [vmem:[#allocation8 + $0x70] sm:$0xff] }
  0x41   :  { %430 = vmatprep.subr.bf16.mxu1 %v564_v0  ;;  %v173_v43 = vld [vmem:[#allocation8 + $0x58] sm:$0xff]  ;;  %v443_v47 = vpack.c.bf16 %v175_v46, %v174_v45 }
  0x42   :  { %408 = vmatpush3.bf16.msra.mxu0 %v407_v14  ;;  %v440_v44 = vpack.c.bf16 %v173_v43, %v172_v42  ;;  %v177_v49 = vld [vmem:[#allocation8 + $0x78] sm:$0xff] }
  0x43   :  { %409 = vmatprep.subr.bf16.mxu0 %v564_v0  ;;  %v446_v50 = vpack.c.bf16 %v177_v49, %v176_v48  ;;  %v292_v51 = vld [vmem:[%s692_s2] ss:$0 sm:$0xff] }
  0x44   :  { %432 = vmatpush3.bf16.msra.mxu1 %v431_v24  ;;  %v293_v56 = vld [vmem:[%s694_s4] ss:$0 sm:$0xff]  ;;  %s567_s4 = smov [#allocation9]  }
  0x45   :  { %433 = vmatprep.subr.bf16.mxu1 %v564_v0  ;;  %v294_v60 = vld [vmem:[%s695_s5] ss:$0 sm:$0xff]  ;;  %s282_s20 = sshll.u32 %s567_s4, 4  ;;  %s283_s20 = int_to_ptr.vmem [resolvable:$true] %s282_s20 }
  0x46   :  { %411 = vmatpush3.bf16.msra.mxu0 %v410_v21  ;;  %s531_s5 = scalar_lea.vmem %s283_s20, 128  ;;  %p536_p11 = scmp.lt.s32.totalorder %s283_s20, %s283_s20 }
  0x47   :  { %412 = vmatprep.subr.bf16.mxu0 %v564_v0  ;;  %p532_p10 = scmp.ne.s32.totalorder %s283_s20, %s531_s5  ;;  %p537_p12 = scmp.lt.s32.totalorder %s531_s5, %s531_s5 }
  0x48   :  { %435 = vmatpush3.bf16.msra.mxu1 %v434_v30 }
  0x49   :  { %436 = vmatprep.subr.bf16.mxu1 %v564_v0  ;;  %p538_p13 = por %p537_p12, %p536_p11 }
  0x4a   :  { %414 = vmatpush3.bf16.msra.mxu0 %v413_v27 }
  0x4b   :  { %415 = vmatprep.subr.bf16.mxu0 %v564_v0  ;;  %p539_p0 = pnand %p538_p13, %p532_p10 }
  0x4c   :  { %438 = vmatpush3.bf16.msra.mxu1 %v437_v36 }
  0x4d   :  { %439 = vmatprep.subr.bf16.mxu1 %v564_v0 }
  0x4e   :  { %417 = vmatpush3.bf16.msra.mxu0 %v416_v33 }
  0x4f   :  { %418 = vmatprep.subr.bf16.mxu0 %v564_v0 }
  0x50   :  { %441 = vmatpush3.bf16.msra.mxu1 %v440_v44 }
  0x51   :  { %442 = vmatprep.subr.bf16.mxu1 %v564_v0 }
  0x52   :  { %420 = vmatpush3.bf16.msra.mxu0 %v419_v37 }
  0x53   :  { %421 = vmatprep.subr.bf16.mxu0 %v564_v0 }
  0x54   :  { %444 = vmatpush3.bf16.msra.mxu1 %v443_v47 }
  0x55   :  { %445 = vmatprep.subr.bf16.mxu1 %v564_v0 }
  0x56   :  { %423 = vmatpush3.bf16.msra.mxu0 %v422_v40 }
  0x58   :  { %447 = vmatpush3.bf16.msra.mxu1 %v446_v50 }
  0x59   :  { %363 = vmatmul.mubr.f32.vlgmr.msra.gmra.mrb[0].mxu0 %v67_v41 }
 0x12c   :  { %v157_v52 = vpop.f32.mrb[0].mxu0 }
 0x12d   :  { %v158_v53 = vadd.f32 %v292_v51, %v157_v52  ;;  %v364_v54 = vpop.f32.mrb[1].mxu0 }
 0x12f   :  { %457 = vtanh.f32 %v158_v53 }
 0x139   :  { %v458_v55 = vpop.eup %457 }
 0x13a   :  { %398 = vmatmul.mubr.f32.vlgmr.msra.gmra.mrb[0].mxu1 %v458_v55 }
 0x20d   :  { %v251_v57 = vpop.f32.mrb[0].mxu1 }
 0x20e   :  { %v252_v58 = vadd.f32 %v293_v56, %v251_v57  ;;  %v399_v59 = vpop.f32.mrb[1].mxu1 }
 0x210   :  { %459 = vtanh.f32 %v252_v58 }
 0x21a   :  { %v460_v61 = vpop.eup %459 }
 0x21b   :  { %v263_v62 = vmul.f32 %v460_v61, %v294_v60 }
 0x21d   :  { %264 = vadd.xlane.f32.xlu0 %v263_v62 }
 0x2aa   :  { %v265_v0 = vpop.xlane.xlu0 %264 }
 0x2ab   :  { %v268_v1 = vadd.f32 %v267_v63, %v265_v0 }
 0x2ad   :  { %v295_v2 = vmul.f32 -1.442695, %v268_v1 }
 0x2af   :  { %461 = vpow2.f32 %v295_v2 }
 0x2b9   :  { %v462_v3 = vpop.eup %461 }
 0x2ba   :  { %v272_v4 = vadd.f32 1.0, %v462_v3 }
 0x2bc   :  { %463 = vrcp.f32 %v272_v4 }
 0x2c6   :  { %v464_v5 = vpop.eup %463 }
 0x2c7   :  { %275 = vst [vmem:[#allocation9] sm:$0xff] %v464_v5 }
 0x2c8   :  { %542 = shalt.err (!%p539_p0)
}
 0x2c9   :  { %s543_s22 = scalar_lea.hbm %s697_s7, 128 }
 0x2ca   :  { %p544_p1 = scmp.ne.s32.totalorder %s697_s7, %s543_s22  ;;  %p547_p2 = scmp.lt.u32.totalorder %s543_s22, %s697_s7 }
 0x2cc   :  { %p549_p3 = pnand %p547_p2, %p544_p1 }
 0x2ce   :  { %552 = shalt.err (!%p549_p3)
}
 0x2cf   :  { %285 = dma.vmem_to_hbm [thread:$0]  %s283_s20, 128, %s697_s7, [#allocation5]  }
 0x2d0   :  { %557 = dma.done.wait [#allocation5], 128  }
 0x2d1   :  { %558 = vsyncadd [#allocation5], 4294967168 }
 0x2d2   :  { %289 = vsyncpa [#allocation4], 1 }
 0x2d3   :  { %290 = vsyncpa [#allocation7], 1 }
 0x2d4   :  { %291 = vsyncpa [#allocation5], 1 }

</bundles_post_ra>
